<compile_context>
chip_gen: v7x
topology: tpu7x:2x2x1
jax: 0.10.0
libtpu: 0.0.40
codegen_flags: <defaults>
</compile_context>

<pallas_src>
import jax
import jax.numpy as jnp
from jax.experimental import pallas as pl
from jax.experimental.pallas import tpu as pltpu

# --- model hyper-parameters (from the PyTorch script) -----------------------
batch_size      = 1
embedding_size  = 10
hidden_size     = 20
input_size      = 5    # vocab size
num_classes     = 5
num_layers      = 1
sequence_length = 6


# --- Pallas kernel: embedding + single-layer tanh RNN + final linear --------
def rnn_embed_kernel(ids_ref,      # SMEM (seq,) int32   (scalar prefetch)
                     emb_w_ref,    # (vocab, emb)      f32
                     w_ih_ref,     # (emb, hidden)     f32  (transposed vs torch)
                     w_hh_ref,     # (hidden, hidden)  f32  (transposed vs torch)
                     bias_ref,     # (1, hidden)       f32  = b_ih + b_hh
                     fc_w_ref,     # (hidden, classes) f32  (transposed vs torch)
                     fc_b_ref,     # (1, classes)      f32
                     out_ref,      # (seq, classes)    f32
                     xw_tbl_ref,   # VMEM scratch (vocab, hidden) f32
                     hs_ref):      # VMEM scratch (seq, hidden)   f32
    # Fused embedding + input projection + biases, computed once (off the
    # recurrence critical path):  xw_tbl[v] = emb_w[v] @ W_ih + (b_ih + b_hh)
    xw_tbl_ref[...] = (
        jnp.dot(emb_w_ref[...], w_ih_ref[...],
                preferred_element_type=jnp.float32)
        + bias_ref[...])                                       # (vocab, hidden)

    w_hh = w_hh_ref[...]
    h = jnp.zeros((1, hidden_size), dtype=jnp.float32)

    # Sequential Elman RNN; per-step serial work is only h @ W_hh + add + tanh.
    for t in range(sequence_length):                            # static unroll
        xw_t = xw_tbl_ref[pl.ds(ids_ref[t], 1), :]              # gather (1, hidden)
        h = jnp.tanh(
            xw_t + jnp.dot(h, w_hh, preferred_element_type=jnp.float32))
        hs_ref[pl.ds(t, 1), :] = h                              # row write, no concat

    # Final linear on out.view(-1, hidden): (seq, hidden) @ (hidden, classes) + b
    out_ref[...] = (jnp.dot(hs_ref[...], fc_w_ref[...],
                            preferred_element_type=jnp.float32)
                    + fc_b_ref[...]).astype(out_ref.dtype)


def model_forward(x_ids, params):
    """x_ids: (batch_size, sequence_length) int32 token ids.
    Returns (seq*batch, num_classes), matching fc(out.view(-1, hidden))."""
    emb_w, w_ih_t, w_hh_t, b_ih, b_hh, fc_w_t, fc_b = params

    bias = b_ih + b_hh                                  # fold the two RNN biases
    flat_ids = x_ids.reshape(-1).astype(jnp.int32)      # (seq,) -> SMEM prefetch

    def full(shape):
        return pl.BlockSpec(shape, lambda i, ids: tuple(0 for _ in shape))

    grid_spec = pltpu.PrefetchScalarGridSpec(
        num_scalar_prefetch=1,
        grid=(1,),
        in_specs=[
            full((input_size, embedding_size)),
            full((embedding_size, hidden_size)),
            full((hidden_size, hidden_size)),
            full((1, hidden_size)),
            full((hidden_size, num_classes)),
            full((1, num_classes)),
        ],
        out_specs=full((batch_size * sequence_length, num_classes)),
        scratch_shapes=[
            pltpu.VMEM((input_size, hidden_size), jnp.float32),      # xw table
            pltpu.VMEM((sequence_length, hidden_size), jnp.float32),  # hidden states
        ],
    )

    out = pl.pallas_call(
        rnn_embed_kernel,
        out_shape=jax.ShapeDtypeStruct(
            (batch_size * sequence_length, num_classes), jnp.float32),
        grid_spec=grid_spec,
        compiler_params=pltpu.CompilerParams(
            dimension_semantics=("arbitrary",)),
    )(flat_ids, emb_w, w_ih_t, w_hh_t, bias, fc_w_t, fc_b)
    return out


def init_params(key):
    """Deterministic parameter init matching the PyTorch module's shapes."""
    ks = jax.random.split(key, 7)
    # nn.Embedding: N(0,1)
    emb_w = jax.random.normal(ks[0], (input_size, embedding_size), jnp.float32)
    # nn.RNN: U(-1/sqrt(hidden), 1/sqrt(hidden)); stored pre-transposed for matmul
    bound = 1.0 / jnp.sqrt(jnp.float32(hidden_size))
    w_ih_t = jax.random.uniform(ks[1], (embedding_size, hidden_size),
                                jnp.float32, -bound, bound)
    w_hh_t = jax.random.uniform(ks[2], (hidden_size, hidden_size),
                                jnp.float32, -bound, bound)
    b_ih = jax.random.uniform(ks[3], (1, hidden_size), jnp.float32, -bound, bound)
    b_hh = jax.random.uniform(ks[4], (1, hidden_size), jnp.float32, -bound, bound)
    # nn.Linear: U(-1/sqrt(in_features), 1/sqrt(in_features))
    fbound = 1.0 / jnp.sqrt(jnp.float32(hidden_size))
    fc_w_t = jax.random.uniform(ks[5], (hidden_size, num_classes),
                                jnp.float32, -fbound, fbound)
    fc_b = jax.random.uniform(ks[6], (1, num_classes), jnp.float32, -fbound, fbound)
    return (emb_w, w_ih_t, w_hh_t, b_ih, b_hh, fc_w_t, fc_b)


def reference_forward(x_ids, params):
    """Pure-JAX reference of the PyTorch forward, for a sanity check."""
    emb_w, w_ih_t, w_hh_t, b_ih, b_hh, fc_w_t, fc_b = params
    emb = emb_w[x_ids.reshape(-1)]                     # (seq, emb)
    h = jnp.zeros((1, hidden_size), jnp.float32)
    outs = []
    for t in range(sequence_length):
        h = jnp.tanh(emb[t:t + 1] @ w_ih_t + b_ih + h @ w_hh_t + b_hh)
        outs.append(h)
    H = jnp.concatenate(outs, axis=0)
    return H @ fc_w_t + fc_b


if __name__ == "__main__":
    key = jax.random.PRNGKey(0)
    k_param, k_x = jax.random.split(key)

    params = init_params(k_param)
    # token ids in [0, input_size), shape (batch, seq) — e.g. the "hihell" ids
    x_ids = jax.random.randint(k_x, (batch_size, sequence_length), 0, input_size,
                               dtype=jnp.int32)

    out = model_forward(x_ids, params)
    out = jax.block_until_ready(out)

    ref = reference_forward(x_ids, params)
    assert out.shape == (batch_size * sequence_length, num_classes)
    assert jnp.allclose(out, ref, atol=1e-4, rtol=1e-4), (
        float(jnp.max(jnp.abs(out - ref))))

    print("KERNEL_OK")
</pallas_src>

<mosaic_0001>
module attributes {stable_mosaic.version = 11 : i64} {
  func.func @rnn_embed_kernel(%arg0: i32, %arg1: memref<6xi32, #tpu.memory_space<smem>>, %arg2: memref<5x10xf32, #tpu.memory_space<vmem>>, %arg3: memref<10x20xf32, #tpu.memory_space<vmem>>, %arg4: memref<20x20xf32, #tpu.memory_space<vmem>>, %arg5: memref<1x20xf32, #tpu.memory_space<vmem>>, %arg6: memref<20x5xf32, #tpu.memory_space<vmem>>, %arg7: memref<1x5xf32, #tpu.memory_space<vmem>>, %arg8: memref<6x5xf32, #tpu.memory_space<vmem>>, %arg9: memref<5x20xf32, #tpu.memory_space<vmem>>, %arg10: memref<6x20xf32, #tpu.memory_space<vmem>>) attributes {dimension_semantics = [#tpu.dimension_semantics<arbitrary>], iteration_bounds = array<i64: 1>, scalar_prefetch = 1 : i64, scratch_operands = 2 : i64, tpu.core_type = #tpu.core_type<tc>, window_params = [{pipeline_mode = #tpu.pipeline_mode<synchronous>, transform_indices = @transform_0, window_bounds = array<i64: 5, 10>}, {pipeline_mode = #tpu.pipeline_mode<synchronous>, transform_indices = @transform_1, window_bounds = array<i64: 10, 20>}, {pipeline_mode = #tpu.pipeline_mode<synchronous>, transform_indices = @transform_2, window_bounds = array<i64: 20, 20>}, {pipeline_mode = #tpu.pipeline_mode<synchronous>, transform_indices = @transform_3, window_bounds = array<i64: 1, 20>}, {pipeline_mode = #tpu.pipeline_mode<synchronous>, transform_indices = @transform_4, window_bounds = array<i64: 20, 5>}, {pipeline_mode = #tpu.pipeline_mode<synchronous>, transform_indices = @transform_5, window_bounds = array<i64: 1, 5>}, {pipeline_mode = #tpu.pipeline_mode<synchronous>, transform_indices = @transform_6, window_bounds = array<i64: 6, 5>}]} {
    %c0 = arith.constant 0 : index
    %c0_0 = arith.constant 0 : index
    %0 = vector.load %arg2[%c0, %c0_0] : memref<5x10xf32, #tpu.memory_space<vmem>>, vector<5x10xf32>
    %c0_1 = arith.constant 0 : index
    %c0_2 = arith.constant 0 : index
    %1 = vector.load %arg3[%c0_1, %c0_2] : memref<10x20xf32, #tpu.memory_space<vmem>>, vector<10x20xf32>
    %cst = arith.constant dense<0.000000e+00> : vector<5x20xf32>
    %2 = tpu.matmul %0, %1, %cst {dimension_numbers = #tpu.dot_dimension_numbers<[1], [0], [0], [1], [0, 0, 1, 1], [], []>} : vector<5x10xf32>, vector<10x20xf32>, vector<5x20xf32> -> vector<5x20xf32>
    %c0_3 = arith.constant 0 : index
    %c0_4 = arith.constant 0 : index
    %3 = vector.load %arg5[%c0_3, %c0_4] : memref<1x20xf32, #tpu.memory_space<vmem>>, vector<1x20xf32>
    %4 = vector.broadcast %3 : vector<1x20xf32> to vector<5x20xf32>
    %5 = arith.addf %2, %4 : vector<5x20xf32>
    %c0_5 = arith.constant 0 : index
    %c0_6 = arith.constant 0 : index
    %6 = vector.load %arg9[%c0_5, %c0_6] : memref<5x20xf32, #tpu.memory_space<vmem>>, vector<5x20xf32>
    tpu.vector_store %arg9[%c0_5, %c0_6], %5 {strides = array<i32>} : memref<5x20xf32, #tpu.memory_space<vmem>>, vector<5x20xf32>,
    %c0_7 = arith.constant 0 : index
    %c0_8 = arith.constant 0 : index
    %7 = vector.load %arg4[%c0_7, %c0_8] : memref<20x20xf32, #tpu.memory_space<vmem>>, vector<20x20xf32>
    %cst_9 = arith.constant 0.000000e+00 : f32
    %8 = vector.broadcast %cst_9 : f32 to vector<1x20xf32>
    %c0_10 = arith.constant 0 : index
    %9 = memref.load %arg1[%c0_10] : memref<6xi32, #tpu.memory_space<smem>>
    %10 = arith.index_cast %9 : i32 to index
    %c0_11 = arith.constant 0 : index
    %11 = vector.load %arg9[%10, %c0_11] : memref<5x20xf32, #tpu.memory_space<vmem>>, vector<1x20xf32>
    %cst_12 = arith.constant dense<0.000000e+00> : vector<1x20xf32>
    %12 = tpu.matmul %8, %7, %cst_12 {dimension_numbers = #tpu.dot_dimension_numbers<[1], [0], [0], [1], [0, 0, 1, 1], [], []>} : vector<1x20xf32>, vector<20x20xf32>, vector<1x20xf32> -> vector<1x20xf32>
    %13 = arith.addf %11, %12 : vector<1x20xf32>
    %14 = math.tanh %13 : vector<1x20xf32>
    %c0_13 = arith.constant 0 : index
    %c0_14 = arith.constant 0 : index
    %15 = vector.load %arg10[%c0_13, %c0_14] : memref<6x20xf32, #tpu.memory_space<vmem>>, vector<1x20xf32>
    tpu.vector_store %arg10[%c0_13, %c0_14], %14 {strides = array<i32>} : memref<6x20xf32, #tpu.memory_space<vmem>>, vector<1x20xf32>,
    %c1 = arith.constant 1 : index
    %16 = memref.load %arg1[%c1] : memref<6xi32, #tpu.memory_space<smem>>
    %17 = arith.index_cast %16 : i32 to index
    %c0_15 = arith.constant 0 : index
    %18 = vector.load %arg9[%17, %c0_15] : memref<5x20xf32, #tpu.memory_space<vmem>>, vector<1x20xf32>
    %cst_16 = arith.constant dense<0.000000e+00> : vector<1x20xf32>
    %19 = tpu.matmul %14, %7, %cst_16 {dimension_numbers = #tpu.dot_dimension_numbers<[1], [0], [0], [1], [0, 0, 1, 1], [], []>} : vector<1x20xf32>, vector<20x20xf32>, vector<1x20xf32> -> vector<1x20xf32>
    %20 = arith.addf %18, %19 : vector<1x20xf32>
    %21 = math.tanh %20 : vector<1x20xf32>
    %c1_17 = arith.constant 1 : index
    %c0_18 = arith.constant 0 : index
    %22 = vector.load %arg10[%c1_17, %c0_18] : memref<6x20xf32, #tpu.memory_space<vmem>>, vector<1x20xf32>
    tpu.vector_store %arg10[%c1_17, %c0_18], %21 {strides = array<i32>} : memref<6x20xf32, #tpu.memory_space<vmem>>, vector<1x20xf32>,
    %c2 = arith.constant 2 : index
    %23 = memref.load %arg1[%c2] : memref<6xi32, #tpu.memory_space<smem>>
    %24 = arith.index_cast %23 : i32 to index
    %c0_19 = arith.constant 0 : index
    %25 = vector.load %arg9[%24, %c0_19] : memref<5x20xf32, #tpu.memory_space<vmem>>, vector<1x20xf32>
    %cst_20 = arith.constant dense<0.000000e+00> : vector<1x20xf32>
    %26 = tpu.matmul %21, %7, %cst_20 {dimension_numbers = #tpu.dot_dimension_numbers<[1], [0], [0], [1], [0, 0, 1, 1], [], []>} : vector<1x20xf32>, vector<20x20xf32>, vector<1x20xf32> -> vector<1x20xf32>
    %27 = arith.addf %25, %26 : vector<1x20xf32>
    %28 = math.tanh %27 : vector<1x20xf32>
    %c2_21 = arith.constant 2 : index
    %c0_22 = arith.constant 0 : index
    %29 = vector.load %arg10[%c2_21, %c0_22] : memref<6x20xf32, #tpu.memory_space<vmem>>, vector<1x20xf32>
    tpu.vector_store %arg10[%c2_21, %c0_22], %28 {strides = array<i32>} : memref<6x20xf32, #tpu.memory_space<vmem>>, vector<1x20xf32>,
    %c3 = arith.constant 3 : index
    %30 = memref.load %arg1[%c3] : memref<6xi32, #tpu.memory_space<smem>>
    %31 = arith.index_cast %30 : i32 to index
    %c0_23 = arith.constant 0 : index
    %32 = vector.load %arg9[%31, %c0_23] : memref<5x20xf32, #tpu.memory_space<vmem>>, vector<1x20xf32>
    %cst_24 = arith.constant dense<0.000000e+00> : vector<1x20xf32>
    %33 = tpu.matmul %28, %7, %cst_24 {dimension_numbers = #tpu.dot_dimension_numbers<[1], [0], [0], [1], [0, 0, 1, 1], [], []>} : vector<1x20xf32>, vector<20x20xf32>, vector<1x20xf32> -> vector<1x20xf32>
    %34 = arith.addf %32, %33 : vector<1x20xf32>
    %35 = math.tanh %34 : vector<1x20xf32>
    %c3_25 = arith.constant 3 : index
    %c0_26 = arith.constant 0 : index
    %36 = vector.load %arg10[%c3_25, %c0_26] : memref<6x20xf32, #tpu.memory_space<vmem>>, vector<1x20xf32>
    tpu.vector_store %arg10[%c3_25, %c0_26], %35 {strides = array<i32>} : memref<6x20xf32, #tpu.memory_space<vmem>>, vector<1x20xf32>,
    %c4 = arith.constant 4 : index
    %37 = memref.load %arg1[%c4] : memref<6xi32, #tpu.memory_space<smem>>
    %38 = arith.index_cast %37 : i32 to index
    %c0_27 = arith.constant 0 : index
    %39 = vector.load %arg9[%38, %c0_27] : memref<5x20xf32, #tpu.memory_space<vmem>>, vector<1x20xf32>
    %cst_28 = arith.constant dense<0.000000e+00> : vector<1x20xf32>
    %40 = tpu.matmul %35, %7, %cst_28 {dimension_numbers = #tpu.dot_dimension_numbers<[1], [0], [0], [1], [0, 0, 1, 1], [], []>} : vector<1x20xf32>, vector<20x20xf32>, vector<1x20xf32> -> vector<1x20xf32>
    %41 = arith.addf %39, %40 : vector<1x20xf32>
    %42 = math.tanh %41 : vector<1x20xf32>
    %c4_29 = arith.constant 4 : index
    %c0_30 = arith.constant 0 : index
    %43 = vector.load %arg10[%c4_29, %c0_30] : memref<6x20xf32, #tpu.memory_space<vmem>>, vector<1x20xf32>
    tpu.vector_store %arg10[%c4_29, %c0_30], %42 {strides = array<i32>} : memref<6x20xf32, #tpu.memory_space<vmem>>, vector<1x20xf32>,
    %c5 = arith.constant 5 : index
    %44 = memref.load %arg1[%c5] : memref<6xi32, #tpu.memory_space<smem>>
    %45 = arith.index_cast %44 : i32 to index
    %c0_31 = arith.constant 0 : index
    %46 = vector.load %arg9[%45, %c0_31] : memref<5x20xf32, #tpu.memory_space<vmem>>, vector<1x20xf32>
    %cst_32 = arith.constant dense<0.000000e+00> : vector<1x20xf32>
    %47 = tpu.matmul %42, %7, %cst_32 {dimension_numbers = #tpu.dot_dimension_numbers<[1], [0], [0], [1], [0, 0, 1, 1], [], []>} : vector<1x20xf32>, vector<20x20xf32>, vector<1x20xf32> -> vector<1x20xf32>
    %48 = arith.addf %46, %47 : vector<1x20xf32>
    %49 = math.tanh %48 : vector<1x20xf32>
    %c5_33 = arith.constant 5 : index
    %c0_34 = arith.constant 0 : index
    %50 = vector.load %arg10[%c5_33, %c0_34] : memref<6x20xf32, #tpu.memory_space<vmem>>, vector<1x20xf32>
    tpu.vector_store %arg10[%c5_33, %c0_34], %49 {strides = array<i32>} : memref<6x20xf32, #tpu.memory_space<vmem>>, vector<1x20xf32>,
    %c0_35 = arith.constant 0 : index
    %c0_36 = arith.constant 0 : index
    %51 = vector.load %arg10[%c0_35, %c0_36] : memref<6x20xf32, #tpu.memory_space<vmem>>, vector<6x20xf32>
    %c0_37 = arith.constant 0 : index
    %c0_38 = arith.constant 0 : index
    %52 = vector.load %arg6[%c0_37, %c0_38] : memref<20x5xf32, #tpu.memory_space<vmem>>, vector<20x5xf32>
    %cst_39 = arith.constant dense<0.000000e+00> : vector<6x5xf32>
    %53 = tpu.matmul %51, %52, %cst_39 {dimension_numbers = #tpu.dot_dimension_numbers<[1], [0], [0], [1], [0, 0, 1, 1], [], []>} : vector<6x20xf32>, vector<20x5xf32>, vector<6x5xf32> -> vector<6x5xf32>
    %c0_40 = arith.constant 0 : index
    %c0_41 = arith.constant 0 : index
    %54 = vector.load %arg7[%c0_40, %c0_41] : memref<1x5xf32, #tpu.memory_space<vmem>>, vector<1x5xf32>
    %55 = vector.broadcast %54 : vector<1x5xf32> to vector<6x5xf32>
    %56 = arith.addf %53, %55 : vector<6x5xf32>
    %c0_42 = arith.constant 0 : index
    %c0_43 = arith.constant 0 : index
    %57 = vector.load %arg8[%c0_42, %c0_43] : memref<6x5xf32, #tpu.memory_space<vmem>>, vector<6x5xf32>
    tpu.vector_store %arg8[%c0_42, %c0_43], %56 {strides = array<i32>} : memref<6x5xf32, #tpu.memory_space<vmem>>, vector<6x5xf32>,
    return
  }
  func.func @transform_0(%arg0: i32, %arg1: memref<6xi32, #tpu.memory_space<smem>>) -> (i32, i32) {
    %c0_i32 = arith.constant 0 : i32
    %c0_i32_0 = arith.constant 0 : i32
    %c0_i32_1 = arith.constant 0 : i32
    return %c0_i32, %c0_i32_0 : i32, i32
  }
  func.func @transform_1(%arg0: i32, %arg1: memref<6xi32, #tpu.memory_space<smem>>) -> (i32, i32) {
    %c0_i32 = arith.constant 0 : i32
    %c0_i32_0 = arith.constant 0 : i32
    %c0_i32_1 = arith.constant 0 : i32
    return %c0_i32, %c0_i32_0 : i32, i32
  }
  func.func @transform_2(%arg0: i32, %arg1: memref<6xi32, #tpu.memory_space<smem>>) -> (i32, i32) {
    %c0_i32 = arith.constant 0 : i32
    %c0_i32_0 = arith.constant 0 : i32
    %c0_i32_1 = arith.constant 0 : i32
    return %c0_i32, %c0_i32_0 : i32, i32
  }
  func.func @transform_3(%arg0: i32, %arg1: memref<6xi32, #tpu.memory_space<smem>>) -> (i32, i32) {
    %c0_i32 = arith.constant 0 : i32
    %c0_i32_0 = arith.constant 0 : i32
    %c0_i32_1 = arith.constant 0 : i32
    return %c0_i32, %c0_i32_0 : i32, i32
  }
  func.func @transform_4(%arg0: i32, %arg1: memref<6xi32, #tpu.memory_space<smem>>) -> (i32, i32) {
    %c0_i32 = arith.constant 0 : i32
    %c0_i32_0 = arith.constant 0 : i32
    %c0_i32_1 = arith.constant 0 : i32
    return %c0_i32, %c0_i32_0 : i32, i32
  }
  func.func @transform_5(%arg0: i32, %arg1: memref<6xi32, #tpu.memory_space<smem>>) -> (i32, i32) {
    %c0_i32 = arith.constant 0 : i32
    %c0_i32_0 = arith.constant 0 : i32
    %c0_i32_1 = arith.constant 0 : i32
    return %c0_i32, %c0_i32_0 : i32, i32
  }
  func.func @transform_6(%arg0: i32, %arg1: memref<6xi32, #tpu.memory_space<smem>>) -> (i32, i32) {
    %c0_i32 = arith.constant 0 : i32
    %c0_i32_0 = arith.constant 0 : i32
    %c0_i32_1 = arith.constant 0 : i32
    return %c0_i32, %c0_i32_0 : i32, i32
  }
}

</mosaic_0001>

<bundles_post_ra>
// kernel: tpu_custom_call.1
= control target key start
LH: loop header
LB: loop body
LE: loop exit
PB: predicated region body
PF: predicated region fallthrough
CT: control target
= control target key end

     0   :  { %s1126_s0 = inlined_call_operand.vmem [shape: s32[6], index: 0, kind: input, shape index: {}]   ;;  %s1127_s1 = inlined_call_operand.hbm [shape: f32[5,10], index: 1, kind: input, shape index: {}]   ;;  %s1128_s2 = inlined_call_operand.vmem [shape: f32[10,20], index: 2, kind: input, shape index: {}]   ;;  %s1129_s3 = inlined_call_operand.vmem [shape: f32[20,20], index: 3, kind: input, shape index: {}]   ;;  %s1130_s4 = inlined_call_operand.vmem [shape: f32[1,20], index: 4, kind: input, shape index: {}]   ;;  %s1131_s5 = inlined_call_operand.vmem [shape: f32[20,5], index: 5, kind: input, shape index: {}]   ;;  %s1132_s6 = inlined_call_operand.vmem [shape: f32[1,5], index: 6, kind: input, shape index: {}]   ;;  %s1133_s7 = inlined_call_operand.hbm [shape: f32[6,5], index: 7, kind: output, shape index: {}]  }
   0x1   :  { %s12_s26 = sshll.u32 %s1126_s0, 4  ;;  %s13_s26 = int_to_ptr.vmem [resolvable:$true] %s12_s26 }
   0x2   :  { %s893_s27 = scalar_lea.vmem %s13_s26, 16  ;;  %p898_p1 = scmp.lt.s32.totalorder %s13_s26, %s13_s26 }
   0x3   :  { %p894_p0 = scmp.ne.s32.totalorder %s13_s26, %s893_s27  ;;  %p899_p2 = scmp.lt.s32.totalorder %s893_s27, %s893_s27 }
   0x5   :  { %p900_p3 = por %p899_p2, %p898_p1 }
   0x7   :  { %p901_p4 = pnand %p900_p3, %p894_p0 }
   0x9   :  { %904 = shalt.err (!%p901_p4)  }
   0xa   :  { %s955_s28 = smov [#allocation5]  }
   0xb   :  { %15 = dma.vmem_to_smem %s13_s26, 16, %s955_s28, [#allocation4] }
   0xc   :  { %949 = dma.done.wait [#allocation4], 16 }
   0xd   :  { %950 = vsyncadd [#allocation4], 4294967280 }
   0xe   :  { %17 = sfence }
   0xf   :  { %18 = vsyncpa [#allocation7], 0 }
  0x10   :  { %19 = vsyncpa [#allocation8], 0  ;;  %s956_s29 = smov [#allocation6]   ;;  %s905_s9 = scalar_lea.hbm %s1127_s1, 128 }
  0x11   :  { %s26_s30 = sshll.u32 %s956_s29, 4  ;;  %p906_p5 = scmp.ne.s32.totalorder %s1127_s1, %s905_s9  ;;  %s27_s30 = int_to_ptr.vmem [resolvable:$true] %s26_s30 }
  0x12   :  { %p909_p6 = scmp.lt.u32.totalorder %s905_s9, %s1127_s1 }
  0x14   :  { %p911_p7 = pnand %p909_p6, %p906_p5 }
  0x16   :  { %914 = shalt.err (!%p911_p7)
}
  0x17   :  { %s915_s14 = scalar_lea.vmem %s27_s30, 128  ;;  %p920_p9 = scmp.lt.s32.totalorder %s27_s30, %s27_s30 }
  0x18   :  { %p916_p8 = scmp.ne.s32.totalorder %s27_s30, %s915_s14  ;;  %p921_p10 = scmp.lt.s32.totalorder %s915_s14, %s915_s14 }
  0x1a   :  { %p922_p11 = por %p921_p10, %p920_p9 }
  0x1c   :  { %p923_p12 = pnand %p922_p11, %p916_p8 }
  0x1e   :  { %926 = shalt.err (!%p923_p12)
}
  0x1f   :  { %29 = dma.hbm_to_vmem [thread:$0]  %s1127_s1, 128, %s27_s30, [#allocation7]  }
  0x20   :  { %951 = dma.done.wait [#allocation7], 128  }
  0x21   :  { %952 = vsyncadd [#allocation7], 4294967168  ;;  %v957_v0 = vmov 0.0|0.0   ;;  %vm958_vm0 = vmmov 0   ;;  %v959_v1 = vmov 0.0   ;;  %vm57_vm1 = vcmask 1041408  }
  0x22   :  { %849 = vmatprep.subr.bf16.mxu0 %v957_v0  ;;  %853 = vmatprep.subr.bf16.mxu1 %v957_v0  ;;  %v44_v2 = vld [vmem:[%s1128_s2] sm:$0xff]  ;;  %v45_v3 = vld [vmem:[%s1128_s2 + $0x8] sm:$0x3]  ;;  %vm960_vm2 = vmmov 1   ;;  %v43_v8 = vld [vmem:[#allocation6] sm:$0x1f] }
  0x23   :  { %783 = vmatprep.mubr.msk.f32.mxu0 %vm958_vm0, %v959_v1  ;;  %792 = vmatprep.mubr.msk.f32.mxu1 %vm958_vm0, %v959_v1  ;;  %vm851_vm3 = vmpackc.low %vm57_vm1, %vm960_vm2  ;;  %v850_v4 = vpack.c.bf16 %v45_v3, %v44_v2  ;;  %v133_v5 = vld [vmem:[%s1129_s3] sm:$0xff]  ;;  %v134_v6 = vld [vmem:[%s1129_s3 + $0x8] sm:$0xff]  ;;  %vm53_vm4 = vcmask 80896   ;;  %vm143_vm5 = vcmask 1043456   ;;  %s136_s26 = sld [smem:[#allocation5]]  ;;  %vm131_vm6 = vcmask 159744  }
  0x24   :  { %v1035_v7 = vpack.c.bf16 %v134_v6, %v133_v5  ;;  %v1043_v9 = vld [vmem:[%s1129_s3 + $0x10] sm:$0xf]  ;;  %v726_v10 = vld [vmem:[%s1130_s4] ss:$0 sm:$0xff]  ;;  %vm219_vm7 = vcmask 155648   ;;  %vm139_vm8 = vcmask 162816  }
  0x25   :  { %852 = vmatpush3.bf16.msk.msra.mxu0 %vm851_vm3, %v850_v4  ;;  %s730_s4 = sld [smem:[#allocation5 + $0x1]]  ;;  %s733_s29 = sld [smem:[#allocation5 + $0x2]]  ;;  %v617_v39 = vld [vmem:[%s1131_s5] sm:$0xff]  ;;  %v618_v40 = vld [vmem:[%s1131_s5 + $0x8] sm:$0xff]  ;;  %v619_v42 = vld [vmem:[%s1131_s5 + $0x10] sm:$0xf] }
  0x26   :  { %855 = vmatpush3.bf16.msra.mxu1 %v1035_v7  ;;  %856 = vmatprep.subr.bf16.mxu0 %v957_v0  ;;  %s736_s8 = sld [smem:[#allocation5 + $0x3]]  ;;  %s739_s9 = sld [smem:[#allocation5 + $0x4]]  ;;  %v872_v41 = vpack.c.bf16 %v618_v40, %v617_v39  ;;  %v745_v49 = vld [vmem:[%s1132_s6] ss:$0 sm:$0xff]  ;;  %vm703_vm9 = vcmask 37888  }
  0x27   :  { %790 = vmatprep.subr.mxu1 %v959_v1  ;;  %s742_s17 = sld [smem:[#allocation5 + $0x5]]  ;;  %s961_s5 = smov [#allocation9]  }
  0x28   :  { %784 = vmatmul.mubr.msk.f32.vlgmr.msra.gmra.mrb[0].mxu0 %vm53_vm4, %v43_v8  ;;  %s711_s20 = sshll.u32 %s961_s5, 4  ;;  %s712_s20 = int_to_ptr.vmem [resolvable:$true] %s711_s20 }
  0x29   :  { %858 = vmatpush3.bf16.msra.mxu0 %v1035_v7  ;;  %801 = vmatprep.mubr.msk.f32.mxu0 %vm958_vm0, %v959_v1  ;;  %s137_s27 = scalar_lea.vmem [#allocation2], %s136_s26  ;;  %s927_s21 = scalar_lea.vmem %s712_s20, 128 }
  0x2a   :  { %791 = vmatpush3.msk.msra.mxu1 %vm143_vm5, %v1043_v9  ;;  %799 = vmatprep.subr.mxu0 %v959_v1  ;;  %p928_p13 = scmp.ne.s32.totalorder %s712_s20, %s927_s21  ;;  %p932_p0 = scmp.lt.s32.totalorder %s712_s20, %s712_s20 }
  0x2b   :  { %793 = vmatmul.mubr.f32.vlgmr.msra.gmra.mrb[0].mxu1 %v959_v1  ;;  %859 = vmatprep.subr.bf16.mxu1 %v957_v0  ;;  %s222_s28 = scalar_lea.vmem [#allocation2], %s730_s4  ;;  %s301_s30 = scalar_lea.vmem [#allocation2], %s733_s29 }
  0x2c   :  { %861 = vmatpush3.bf16.msra.mxu1 %v1035_v7  ;;  %810 = vmatprep.mubr.msk.f32.mxu1 %vm958_vm0, %v959_v1  ;;  %s380_s0 = scalar_lea.vmem [#allocation2], %s736_s8  ;;  %s459_s10 = scalar_lea.vmem [#allocation2], %s739_s9 }
  0x2d   :  { %800 = vmatpush3.msk.msra.mxu0 %vm143_vm5, %v1043_v9  ;;  %808 = vmatprep.subr.mxu1 %v959_v1  ;;  %s538_s18 = scalar_lea.vmem [#allocation2], %s742_s17  ;;  %p933_p1 = scmp.lt.s32.totalorder %s927_s21, %s927_s21 }
  0x2e   :  { %862 = vmatprep.subr.bf16.mxu0 %v957_v0 }
  0x2f   :  { %p934_p2 = por %p933_p1, %p932_p0 }
  0x30   :  { %809 = vmatpush3.msk.msra.mxu1 %vm143_vm5, %v1043_v9 }
  0x31   :  { %865 = vmatprep.subr.bf16.mxu1 %v957_v0  ;;  %p935_p3 = pnand %p934_p2, %p928_p13 }
  0xfb   :  { %v127_v11 = vpop.f32.mrb[0].mxu0 }
  0xfc   :  { %v128_v12 = vadd.f32 %v726_v10, %v127_v11  ;;  %v785_v13 = vpop.f32.mrb[1].mxu0 }
  0xfe   :  { %132 = vst.msk [vmem:[#allocation2] sm:$0x1f] %vm131_vm6, %v128_v12  ;;  %v213_v14 = vpop.f32.mrb[0].mxu1 }
  0xff   :  { %v794_v15 = vpop.f32.mrb[1].mxu1 }
 0x105   :  { %v138_v16 = vld [vmem:[%s137_s27] sm:$0x1] }
 0x106   :  { %v217_v17 = vadd.f32 %v213_v14, %v138_v16  ;;  %v223_v19 = vld [vmem:[%s222_s28] sm:$0x1] }
 0x107   :  { %v302_v24 = vld [vmem:[%s301_s30] sm:$0x1] }
 0x108   :  { %881 = vtanh.f32 %v217_v17  ;;  %v381_v29 = vld [vmem:[%s380_s0] sm:$0x1] }
 0x109   :  { %v460_v34 = vld [vmem:[%s459_s10] sm:$0x1] }
 0x10a   :  { %v539_v43 = vld [vmem:[%s538_s18] sm:$0x1] }
 0x112   :  { %v882_v18 = vpop.eup %881 }
 0x113   :  { %220 = vst.msk [vmem:[#allocation3] sm:$0x1] %vm219_vm7, %v882_v18  ;;  %802 = vmatmul.mubr.msk.f32.vlgmr.msra.gmra.mrb[2].mxu0 %vm139_vm8, %v882_v18 }
 0x114   :  { %864 = vmatpush3.bf16.msra.mxu0 %v1035_v7  ;;  %819 = vmatprep.mubr.msk.f32.mxu0 %vm958_vm0, %v959_v1 }
 0x115   :  { %817 = vmatprep.subr.mxu0 %v959_v1 }
 0x118   :  { %818 = vmatpush3.msk.msra.mxu0 %vm143_vm5, %v1043_v9 }
 0x119   :  { %868 = vmatprep.subr.bf16.mxu0 %v957_v0 }
 0x1e6   :  { %v293_v20 = vpop.f32.mrb[2].mxu0 }
 0x1e7   :  { %v297_v21 = vadd.f32 %v293_v20, %v223_v19  ;;  %v803_v22 = vpop.f32.mrb[3].mxu0 }
 0x1e9   :  { %883 = vtanh.f32 %v297_v21 }
 0x1f3   :  { %v884_v23 = vpop.eup %883 }
 0x1f4   :  { %299 = vst.msk [vmem:[#allocation3 + $0x1] sm:$0x1] %vm219_vm7, %v884_v23  ;;  %811 = vmatmul.mubr.msk.f32.vlgmr.msra.gmra.mrb[2].mxu1 %vm139_vm8, %v884_v23 }
 0x1f5   :  { %867 = vmatpush3.bf16.msra.mxu1 %v1035_v7  ;;  %828 = vmatprep.mubr.msk.f32.mxu1 %vm958_vm0, %v959_v1 }
 0x1f6   :  { %826 = vmatprep.subr.mxu1 %v959_v1 }
 0x1f9   :  { %827 = vmatpush3.msk.msra.mxu1 %vm143_vm5, %v1043_v9 }
 0x1fa   :  { %871 = vmatprep.subr.bf16.mxu1 %v957_v0 }
 0x2c7   :  { %v372_v25 = vpop.f32.mrb[2].mxu1 }
 0x2c8   :  { %v376_v26 = vadd.f32 %v372_v25, %v302_v24  ;;  %v812_v27 = vpop.f32.mrb[3].mxu1 }
 0x2ca   :  { %885 = vtanh.f32 %v376_v26 }
 0x2d4   :  { %v886_v28 = vpop.eup %885 }
 0x2d5   :  { %378 = vst.msk [vmem:[#allocation3 + $0x2] sm:$0x1] %vm219_vm7, %v886_v28  ;;  %820 = vmatmul.mubr.msk.f32.vlgmr.msra.gmra.mrb[4].mxu0 %vm139_vm8, %v886_v28 }
 0x2d6   :  { %870 = vmatpush3.bf16.msra.mxu0 %v1035_v7  ;;  %837 = vmatprep.mubr.msk.f32.mxu0 %vm958_vm0, %v959_v1 }
 0x2d7   :  { %835 = vmatprep.subr.mxu0 %v959_v1 }
 0x2da   :  { %836 = vmatpush3.msk.msra.mxu0 %vm143_vm5, %v1043_v9 }
 0x3a8   :  { %v451_v30 = vpop.f32.mrb[4].mxu0 }
 0x3a9   :  { %v455_v31 = vadd.f32 %v451_v30, %v381_v29  ;;  %v821_v32 = vpop.f32.mrb[5].mxu0 }
 0x3ab   :  { %887 = vtanh.f32 %v455_v31 }
 0x3b5   :  { %v888_v33 = vpop.eup %887 }
 0x3b6   :  { %457 = vst.msk [vmem:[#allocation3 + $0x3] sm:$0x1] %vm219_vm7, %v888_v33  ;;  %829 = vmatmul.mubr.msk.f32.vlgmr.msra.gmra.mrb[4].mxu1 %vm139_vm8, %v888_v33 }
 0x3b7   :  { %846 = vmatprep.mubr.msk.f32.mxu1 %vm958_vm0, %v959_v1  ;;  %873 = vmatpush3.bf16.msra.mxu1 %v872_v41 }
 0x3b8   :  { %844 = vmatprep.subr.mxu1 %v959_v1 }
 0x3bb   :  { %845 = vmatpush3.msk.msra.mxu1 %vm143_vm5, %v619_v42 }
 0x489   :  { %v530_v35 = vpop.f32.mrb[4].mxu1 }
 0x48a   :  { %v534_v36 = vadd.f32 %v530_v35, %v460_v34  ;;  %v830_v37 = vpop.f32.mrb[5].mxu1 }
 0x48c   :  { %889 = vtanh.f32 %v534_v36 }
 0x496   :  { %v890_v38 = vpop.eup %889 }
 0x497   :  { %536 = vst.msk [vmem:[#allocation3 + $0x4] sm:$0x1] %vm219_vm7, %v890_v38  ;;  %838 = vmatmul.mubr.msk.f32.vlgmr.msra.gmra.mrb[6].mxu0 %vm139_vm8, %v890_v38 }
 0x56a   :  { %v609_v44 = vpop.f32.mrb[6].mxu0 }
 0x56b   :  { %v613_v45 = vadd.f32 %v609_v44, %v539_v43  ;;  %v839_v46 = vpop.f32.mrb[7].mxu0 }
 0x56d   :  { %891 = vtanh.f32 %v613_v45 }
 0x577   :  { %v892_v47 = vpop.eup %891 }
 0x578   :  { %615 = vst.msk [vmem:[#allocation3 + $0x5] sm:$0x1] %vm219_vm7, %v892_v47 }
 0x57f   :  { %v616_v48 = vld [vmem:[#allocation3] sm:$0x3f] }
 0x580   :  { %847 = vmatmul.mubr.msk.f32.vlgmr.msra.gmra.mrb[6].mxu1 %vm139_vm8, %v616_v48 }
 0x653   :  { %v699_v50 = vpop.f32.mrb[6].mxu1 }
 0x654   :  { %v700_v51 = vadd.f32 %v745_v49, %v699_v50  ;;  %v848_v52 = vpop.f32.mrb[7].mxu1 }
 0x656   :  { %704 = vst.msk [vmem:[#allocation9] sm:$0x3f] %vm703_vm9, %v700_v51 }
 0x657   :  { %938 = shalt.err (!%p935_p3)
}
 0x658   :  { %s939_s2 = scalar_lea.hbm %s1133_s7, 128 }
 0x659   :  { %p940_p4 = scmp.ne.s32.totalorder %s1133_s7, %s939_s2  ;;  %p943_p5 = scmp.lt.u32.totalorder %s939_s2, %s1133_s7 }
 0x65b   :  { %p945_p6 = pnand %p943_p5, %p940_p4 }
 0x65d   :  { %948 = shalt.err (!%p945_p6)
}
 0x65e   :  { %714 = dma.vmem_to_hbm [thread:$0]  %s712_s20, 128, %s1133_s7, [#allocation8]  }
 0x65f   :  { %953 = dma.done.wait [#allocation8], 128  }
 0x660   :  { %954 = vsyncadd [#allocation8], 4294967168 }
 0x661   :  { %718 = vsyncpa [#allocation7], 1 }
 0x662   :  { %719 = vsyncpa [#allocation8], 1 }

</bundles_post_ra>
